<compile_context>
chip_gen: v5e
topology: v5e:2x2
jax: 0.10.0
libtpu: 0.0.40
codegen_flags: <defaults>
</compile_context>

<pallas_src>
import functools

import jax
import jax.numpy as jnp
from jax.experimental import pallas as pl
from jax.experimental.pallas import tpu as pltpu


def _leaky_relu(x, slope=0.1):
    # single VPU max per element (valid since slope > 0)
    return jnp.maximum(x, slope * x)


def _round_up(n, m):
    return ((n + m - 1) // m) * m


def vae_kernel(
    x_ref, eps_ref,
    w1_ref, b1_ref, w2_ref, b2_ref,                       # encoder L1, L2
    w3mu_ref, b3mu_ref, w3lv_ref, b3lv_ref,               # encoder L3 (split)
    w4_ref, b4_ref, w5_ref, b5_ref, w6_ref, b6_ref,       # decoder
    out_ref,                                              # packed: x_recon||mu||logvar||pad
    *, use_bf16, pad_lanes,
):
    def mm(a, w_ref):
        w = w_ref[...]
        if use_bf16:
            a = a.astype(jnp.bfloat16)       # weights already bf16 (wrapper)
        return jnp.dot(a, w, preferred_element_type=jnp.float32)

    x = x_ref[...]                                         # (TB, D_in) f32

    # ----- encoder -----
    h = _leaky_relu(mm(x, w1_ref) + b1_ref[...])
    # Dropout(0.1): eval mode -> identity
    h = _leaky_relu(mm(h, w2_ref) + b2_ref[...])
    mu = mm(h, w3mu_ref) + b3mu_ref[...]                   # (TB, L) f32
    logvar = mm(h, w3lv_ref) + b3lv_ref[...]               # (TB, L) f32

    # ----- reparameterize -----
    std = jnp.exp(0.5 * logvar)
    z = mu + eps_ref[...] * std

    # ----- decoder -----
    d = _leaky_relu(mm(z, w4_ref) + b4_ref[...])
    d = _leaky_relu(mm(d, w5_ref) + b5_ref[...])
    x_recon = jax.nn.sigmoid(mm(d, w6_ref) + b6_ref[...])  # (TB, D_in) f32

    # ----- single lane-dense packed store -----
    pieces = [x_recon, mu, logvar]
    if pad_lanes > 0:
        pieces.append(jnp.zeros((x_recon.shape[0], pad_lanes), jnp.float32))
    out_ref[...] = jnp.concatenate(pieces, axis=-1)


def _pick_tile_b(B, max_tile=1024):
    """Whole batch if it fits one step, else largest multiple-of-8 divisor <= max_tile."""
    if B <= max_tile:
        return B
    for t in range(max_tile, 7, -1):
        if B % t == 0 and t % 8 == 0:
            return t
    return B  # fallback: single grid step over the whole batch


def _prepare_params(params, latent_dim, use_bf16):
    """Split encoder L3 into mu/logvar halves; cast weights (not biases) to bf16."""
    (w1, b1), (w2, b2), (w3, b3), (w4, b4), (w5, b5), (w6, b6) = params
    w3mu, w3lv = w3[:, :latent_dim], w3[:, latent_dim:]
    b3mu, b3lv = b3[:, :latent_dim], b3[:, latent_dim:]
    ws = [w1, w2, w3mu, w3lv, w4, w5, w6]
    bs = [b1, b2, b3mu, b3lv, b4, b5, b6]
    if use_bf16:
        ws = [w.astype(jnp.bfloat16) for w in ws]
    return ws, bs


def vae_forward(x, eps, params, *, latent_dim, tile_b=None, use_bf16=True):
    B, D_in = x.shape
    if tile_b is None:
        tile_b = _pick_tile_b(B)
    assert B % tile_b == 0, "batch must be a multiple of the batch tile"

    total = D_in + 2 * latent_dim
    P = _round_up(total, 128)          # lane-dense packed output width
    pad_lanes = P - total

    ws, bs = _prepare_params(params, latent_dim, use_bf16)
    w1, w2, w3mu, w3lv, w4, w5, w6 = ws
    b1, b2, b3mu, b3lv, b4, b5, b6 = bs

    def resident(arr):
        # whole-array block, resident (constant block index) across the batch grid
        return pl.BlockSpec(arr.shape, lambda i: (0, 0))

    grid = (B // tile_b,)

    in_specs = [
        pl.BlockSpec((tile_b, D_in), lambda i: (i, 0)),        # x
        pl.BlockSpec((tile_b, latent_dim), lambda i: (i, 0)),  # eps
    ]
    for w, b in zip(ws, bs):
        in_specs += [resident(w), resident(b)]

    out_specs = pl.BlockSpec((tile_b, P), lambda i: (i, 0))    # packed output
    out_shape = jax.ShapeDtypeStruct((B, P), jnp.float32)

    kernel = functools.partial(vae_kernel, use_bf16=use_bf16, pad_lanes=pad_lanes)

    packed = pl.pallas_call(
        kernel,
        out_shape=out_shape,
        grid_spec=pltpu.PrefetchScalarGridSpec(
            num_scalar_prefetch=0,
            grid=grid,
            in_specs=in_specs,
            out_specs=out_specs,
        ),
        compiler_params=pltpu.CompilerParams(
            # total VMEM footprint is only a few MiB even at tile_b=1024,
            # so the default scoped limit is more than sufficient on v5e/v6e/v7x.
            dimension_semantics=("parallel",),
        ),
    )(x, eps, w1, b1, w2, b2, w3mu, b3mu, w3lv, b3lv, w4, b4, w5, b5, w6, b6)

    x_recon = packed[:, :D_in]
    mu = packed[:, D_in:D_in + latent_dim]
    logvar = packed[:, D_in + latent_dim:D_in + 2 * latent_dim]
    return x_recon, mu, logvar


def init_linear(key, fan_in, fan_out):
    """PyTorch-style Linear init: U(-1/sqrt(fan_in), 1/sqrt(fan_in)).

    Returns W as (fan_in, fan_out) (pre-transposed for x @ W) and b as (1, fan_out).
    """
    kw, kb = jax.random.split(key)
    bound = 1.0 / jnp.sqrt(fan_in)
    w = jax.random.uniform(kw, (fan_in, fan_out), jnp.float32, -bound, bound)
    b = jax.random.uniform(kb, (1, fan_out), jnp.float32, -bound, bound)
    return w, b


def reference_forward(x, eps, params, latent_dim, use_bf16):
    """Plain-JAX reference mirroring the kernel math (dropout in eval mode)."""
    ws, bs = _prepare_params(params, latent_dim, use_bf16)
    w1, w2, w3mu, w3lv, w4, w5, w6 = ws
    b1, b2, b3mu, b3lv, b4, b5, b6 = bs

    def mm(a, w):
        if use_bf16:
            a = a.astype(jnp.bfloat16)
        return jnp.dot(a, w, preferred_element_type=jnp.float32)

    h = _leaky_relu(mm(x, w1) + b1)
    h = _leaky_relu(mm(h, w2) + b2)
    mu = mm(h, w3mu) + b3mu
    logvar = mm(h, w3lv) + b3lv
    z = mu + eps * jnp.exp(0.5 * logvar)
    d = _leaky_relu(mm(z, w4) + b4)
    d = _leaky_relu(mm(d, w5) + b5)
    x_recon = jax.nn.sigmoid(mm(d, w6) + b6)
    return x_recon, mu, logvar


def reference_forward_f32(x, eps, params, latent_dim):
    """Full-f32 reference (sanity check that bf16 matmuls stay close)."""
    (w1, b1), (w2, b2), (w3, b3), (w4, b4), (w5, b5), (w6, b6) = params
    h = _leaky_relu(x @ w1 + b1)
    h = _leaky_relu(h @ w2 + b2)
    h = h @ w3 + b3
    mu, logvar = h[:, :latent_dim], h[:, latent_dim:]
    z = mu + eps * jnp.exp(0.5 * logvar)
    d = _leaky_relu(z @ w4 + b4)
    d = _leaky_relu(d @ w5 + b5)
    x_recon = jax.nn.sigmoid(d @ w6 + b6)
    return x_recon, mu, logvar


if __name__ == "__main__":
    input_dim = 64
    latent_dim = 16
    batch = 16

    root = jax.random.PRNGKey(0)
    keys = jax.random.split(root, 8)

    params = (
        init_linear(keys[0], input_dim, 256),          # encoder L1
        init_linear(keys[1], 256, 128),                # encoder L2
        init_linear(keys[2], 128, latent_dim * 2),     # encoder L3
        init_linear(keys[3], latent_dim, 128),         # decoder L1
        init_linear(keys[4], 128, 256),                # decoder L2
        init_linear(keys[5], 256, input_dim),          # decoder L3
    )

    x = jax.random.normal(keys[6], (batch, input_dim), jnp.float32)
    eps = jax.random.normal(keys[7], (batch, latent_dim), jnp.float32)

    x_recon, mu, logvar = vae_forward(x, eps, params, latent_dim=latent_dim)
    jax.block_until_ready((x_recon, mu, logvar))

    # tight check vs. reference with identical bf16-matmul / f32-accum math
    xr_ref, mu_ref, lv_ref = reference_forward(x, eps, params, latent_dim, use_bf16=True)
    assert jnp.allclose(x_recon, xr_ref, atol=2e-3, rtol=2e-3)
    assert jnp.allclose(mu, mu_ref, atol=2e-3, rtol=2e-3)
    assert jnp.allclose(logvar, lv_ref, atol=2e-3, rtol=2e-3)

    # loose sanity check vs. full-f32 math
    xr32, mu32, lv32 = reference_forward_f32(x, eps, params, latent_dim)
    assert jnp.allclose(x_recon, xr32, atol=5e-2, rtol=5e-2)
    assert jnp.allclose(mu, mu32, atol=5e-2, rtol=5e-2)
    assert jnp.allclose(logvar, lv32, atol=5e-2, rtol=5e-2)

    print("KERNEL_OK")
</pallas_src>

<mosaic_0001>
module attributes {stable_mosaic.version = 11 : i64} {
  func.func @vae_kernel(%arg0: i32, %arg1: memref<16x64xf32, #tpu.memory_space<vmem>>, %arg2: memref<16x16xf32, #tpu.memory_space<vmem>>, %arg3: memref<64x256xbf16, #tpu.memory_space<vmem>>, %arg4: memref<1x256xf32, #tpu.memory_space<vmem>>, %arg5: memref<256x128xbf16, #tpu.memory_space<vmem>>, %arg6: memref<1x128xf32, #tpu.memory_space<vmem>>, %arg7: memref<128x16xbf16, #tpu.memory_space<vmem>>, %arg8: memref<1x16xf32, #tpu.memory_space<vmem>>, %arg9: memref<128x16xbf16, #tpu.memory_space<vmem>>, %arg10: memref<1x16xf32, #tpu.memory_space<vmem>>, %arg11: memref<16x128xbf16, #tpu.memory_space<vmem>>, %arg12: memref<1x128xf32, #tpu.memory_space<vmem>>, %arg13: memref<128x256xbf16, #tpu.memory_space<vmem>>, %arg14: memref<1x256xf32, #tpu.memory_space<vmem>>, %arg15: memref<256x64xbf16, #tpu.memory_space<vmem>>, %arg16: memref<1x64xf32, #tpu.memory_space<vmem>>, %arg17: memref<16x128xf32, #tpu.memory_space<vmem>>) attributes {dimension_semantics = [#tpu.dimension_semantics<parallel>], iteration_bounds = array<i64: 1>, scalar_prefetch = 0 : i64, scratch_operands = 0 : i64, tpu.core_type = #tpu.core_type<tc>, window_params = [{transform_indices = @transform_0, window_bounds = array<i64: 16, 64>}, {transform_indices = @transform_1, window_bounds = array<i64: 16, 16>}, {pipeline_mode = #tpu.pipeline_mode<synchronous>, transform_indices = @transform_2, window_bounds = array<i64: 64, 256>}, {pipeline_mode = #tpu.pipeline_mode<synchronous>, transform_indices = @transform_3, window_bounds = array<i64: 1, 256>}, {pipeline_mode = #tpu.pipeline_mode<synchronous>, transform_indices = @transform_4, window_bounds = array<i64: 256, 128>}, {pipeline_mode = #tpu.pipeline_mode<synchronous>, transform_indices = @transform_5, window_bounds = array<i64: 1, 128>}, {pipeline_mode = #tpu.pipeline_mode<synchronous>, transform_indices = @transform_6, window_bounds = array<i64: 128, 16>}, {pipeline_mode = #tpu.pipeline_mode<synchronous>, transform_indices = @transform_7, window_bounds = array<i64: 1, 16>}, {pipeline_mode = #tpu.pipeline_mode<synchronous>, transform_indices = @transform_8, window_bounds = array<i64: 128, 16>}, {pipeline_mode = #tpu.pipeline_mode<synchronous>, transform_indices = @transform_9, window_bounds = array<i64: 1, 16>}, {pipeline_mode = #tpu.pipeline_mode<synchronous>, transform_indices = @transform_10, window_bounds = array<i64: 16, 128>}, {pipeline_mode = #tpu.pipeline_mode<synchronous>, transform_indices = @transform_11, window_bounds = array<i64: 1, 128>}, {pipeline_mode = #tpu.pipeline_mode<synchronous>, transform_indices = @transform_12, window_bounds = array<i64: 128, 256>}, {pipeline_mode = #tpu.pipeline_mode<synchronous>, transform_indices = @transform_13, window_bounds = array<i64: 1, 256>}, {pipeline_mode = #tpu.pipeline_mode<synchronous>, transform_indices = @transform_14, window_bounds = array<i64: 256, 64>}, {pipeline_mode = #tpu.pipeline_mode<synchronous>, transform_indices = @transform_15, window_bounds = array<i64: 1, 64>}, {transform_indices = @transform_16, window_bounds = array<i64: 16, 128>}]} {
    %c0 = arith.constant 0 : index
    %c0_0 = arith.constant 0 : index
    %0 = vector.load %arg1[%c0, %c0_0] : memref<16x64xf32, #tpu.memory_space<vmem>>, vector<16x64xf32>
    %c0_1 = arith.constant 0 : index
    %c0_2 = arith.constant 0 : index
    %1 = vector.load %arg3[%c0_1, %c0_2] : memref<64x256xbf16, #tpu.memory_space<vmem>>, vector<64x256xbf16>
    %2 = arith.truncf %0 : vector<16x64xf32> to vector<16x64xbf16>
    %cst = arith.constant dense<0.000000e+00> : vector<16x256xf32>
    %3 = tpu.matmul %2, %1, %cst {dimension_numbers = #tpu.dot_dimension_numbers<[1], [0], [0], [1], [0, 0, 1, 1], [], []>} : vector<16x64xbf16>, vector<64x256xbf16>, vector<16x256xf32> -> vector<16x256xf32>
    %c0_3 = arith.constant 0 : index
    %c0_4 = arith.constant 0 : index
    %4 = vector.load %arg4[%c0_3, %c0_4] : memref<1x256xf32, #tpu.memory_space<vmem>>, vector<1x256xf32>
    %5 = vector.broadcast %4 : vector<1x256xf32> to vector<16x256xf32>
    %6 = arith.addf %3, %5 : vector<16x256xf32>
    %cst_5 = arith.constant 1.000000e-01 : f32
    %7 = vector.broadcast %cst_5 : f32 to vector<16x256xf32>
    %8 = arith.mulf %7, %6 : vector<16x256xf32>
    %9 = arith.maximumf %6, %8 : vector<16x256xf32>
    %c0_6 = arith.constant 0 : index
    %c0_7 = arith.constant 0 : index
    %10 = vector.load %arg5[%c0_6, %c0_7] : memref<256x128xbf16, #tpu.memory_space<vmem>>, vector<256x128xbf16>
    %11 = arith.truncf %9 : vector<16x256xf32> to vector<16x256xbf16>
    %cst_8 = arith.constant dense<0.000000e+00> : vector<16x128xf32>
    %12 = tpu.matmul %11, %10, %cst_8 {dimension_numbers = #tpu.dot_dimension_numbers<[1], [0], [0], [1], [0, 0, 1, 1], [], []>} : vector<16x256xbf16>, vector<256x128xbf16>, vector<16x128xf32> -> vector<16x128xf32>
    %c0_9 = arith.constant 0 : index
    %c0_10 = arith.constant 0 : index
    %13 = vector.load %arg6[%c0_9, %c0_10] : memref<1x128xf32, #tpu.memory_space<vmem>>, vector<1x128xf32>
    %14 = vector.broadcast %13 : vector<1x128xf32> to vector<16x128xf32>
    %15 = arith.addf %12, %14 : vector<16x128xf32>
    %cst_11 = arith.constant 1.000000e-01 : f32
    %16 = vector.broadcast %cst_11 : f32 to vector<16x128xf32>
    %17 = arith.mulf %16, %15 : vector<16x128xf32>
    %18 = arith.maximumf %15, %17 : vector<16x128xf32>
    %c0_12 = arith.constant 0 : index
    %c0_13 = arith.constant 0 : index
    %19 = vector.load %arg7[%c0_12, %c0_13] : memref<128x16xbf16, #tpu.memory_space<vmem>>, vector<128x16xbf16>
    %20 = arith.truncf %18 : vector<16x128xf32> to vector<16x128xbf16>
    %cst_14 = arith.constant dense<0.000000e+00> : vector<16x16xf32>
    %21 = tpu.matmul %20, %19, %cst_14 {dimension_numbers = #tpu.dot_dimension_numbers<[1], [0], [0], [1], [0, 0, 1, 1], [], []>} : vector<16x128xbf16>, vector<128x16xbf16>, vector<16x16xf32> -> vector<16x16xf32>
    %c0_15 = arith.constant 0 : index
    %c0_16 = arith.constant 0 : index
    %22 = vector.load %arg8[%c0_15, %c0_16] : memref<1x16xf32, #tpu.memory_space<vmem>>, vector<1x16xf32>
    %23 = vector.broadcast %22 : vector<1x16xf32> to vector<16x16xf32>
    %24 = arith.addf %21, %23 : vector<16x16xf32>
    %c0_17 = arith.constant 0 : index
    %c0_18 = arith.constant 0 : index
    %25 = vector.load %arg9[%c0_17, %c0_18] : memref<128x16xbf16, #tpu.memory_space<vmem>>, vector<128x16xbf16>
    %26 = arith.truncf %18 : vector<16x128xf32> to vector<16x128xbf16>
    %cst_19 = arith.constant dense<0.000000e+00> : vector<16x16xf32>
    %27 = tpu.matmul %26, %25, %cst_19 {dimension_numbers = #tpu.dot_dimension_numbers<[1], [0], [0], [1], [0, 0, 1, 1], [], []>} : vector<16x128xbf16>, vector<128x16xbf16>, vector<16x16xf32> -> vector<16x16xf32>
    %c0_20 = arith.constant 0 : index
    %c0_21 = arith.constant 0 : index
    %28 = vector.load %arg10[%c0_20, %c0_21] : memref<1x16xf32, #tpu.memory_space<vmem>>, vector<1x16xf32>
    %29 = vector.broadcast %28 : vector<1x16xf32> to vector<16x16xf32>
    %30 = arith.addf %27, %29 : vector<16x16xf32>
    %cst_22 = arith.constant 5.000000e-01 : f32
    %31 = vector.broadcast %cst_22 : f32 to vector<16x16xf32>
    %32 = arith.mulf %31, %30 : vector<16x16xf32>
    %33 = math.exp %32 : vector<16x16xf32>
    %c0_23 = arith.constant 0 : index
    %c0_24 = arith.constant 0 : index
    %34 = vector.load %arg2[%c0_23, %c0_24] : memref<16x16xf32, #tpu.memory_space<vmem>>, vector<16x16xf32>
    %35 = arith.mulf %34, %33 : vector<16x16xf32>
    %36 = arith.addf %24, %35 : vector<16x16xf32>
    %c0_25 = arith.constant 0 : index
    %c0_26 = arith.constant 0 : index
    %37 = vector.load %arg11[%c0_25, %c0_26] : memref<16x128xbf16, #tpu.memory_space<vmem>>, vector<16x128xbf16>
    %38 = arith.truncf %36 : vector<16x16xf32> to vector<16x16xbf16>
    %cst_27 = arith.constant dense<0.000000e+00> : vector<16x128xf32>
    %39 = tpu.matmul %38, %37, %cst_27 {dimension_numbers = #tpu.dot_dimension_numbers<[1], [0], [0], [1], [0, 0, 1, 1], [], []>} : vector<16x16xbf16>, vector<16x128xbf16>, vector<16x128xf32> -> vector<16x128xf32>
    %c0_28 = arith.constant 0 : index
    %c0_29 = arith.constant 0 : index
    %40 = vector.load %arg12[%c0_28, %c0_29] : memref<1x128xf32, #tpu.memory_space<vmem>>, vector<1x128xf32>
    %41 = vector.broadcast %40 : vector<1x128xf32> to vector<16x128xf32>
    %42 = arith.addf %39, %41 : vector<16x128xf32>
    %cst_30 = arith.constant 1.000000e-01 : f32
    %43 = vector.broadcast %cst_30 : f32 to vector<16x128xf32>
    %44 = arith.mulf %43, %42 : vector<16x128xf32>
    %45 = arith.maximumf %42, %44 : vector<16x128xf32>
    %c0_31 = arith.constant 0 : index
    %c0_32 = arith.constant 0 : index
    %46 = vector.load %arg13[%c0_31, %c0_32] : memref<128x256xbf16, #tpu.memory_space<vmem>>, vector<128x256xbf16>
    %47 = arith.truncf %45 : vector<16x128xf32> to vector<16x128xbf16>
    %cst_33 = arith.constant dense<0.000000e+00> : vector<16x256xf32>
    %48 = tpu.matmul %47, %46, %cst_33 {dimension_numbers = #tpu.dot_dimension_numbers<[1], [0], [0], [1], [0, 0, 1, 1], [], []>} : vector<16x128xbf16>, vector<128x256xbf16>, vector<16x256xf32> -> vector<16x256xf32>
    %c0_34 = arith.constant 0 : index
    %c0_35 = arith.constant 0 : index
    %49 = vector.load %arg14[%c0_34, %c0_35] : memref<1x256xf32, #tpu.memory_space<vmem>>, vector<1x256xf32>
    %50 = vector.broadcast %49 : vector<1x256xf32> to vector<16x256xf32>
    %51 = arith.addf %48, %50 : vector<16x256xf32>
    %cst_36 = arith.constant 1.000000e-01 : f32
    %52 = vector.broadcast %cst_36 : f32 to vector<16x256xf32>
    %53 = arith.mulf %52, %51 : vector<16x256xf32>
    %54 = arith.maximumf %51, %53 : vector<16x256xf32>
    %c0_37 = arith.constant 0 : index
    %c0_38 = arith.constant 0 : index
    %55 = vector.load %arg15[%c0_37, %c0_38] : memref<256x64xbf16, #tpu.memory_space<vmem>>, vector<256x64xbf16>
    %56 = arith.truncf %54 : vector<16x256xf32> to vector<16x256xbf16>
    %cst_39 = arith.constant dense<0.000000e+00> : vector<16x64xf32>
    %57 = tpu.matmul %56, %55, %cst_39 {dimension_numbers = #tpu.dot_dimension_numbers<[1], [0], [0], [1], [0, 0, 1, 1], [], []>} : vector<16x256xbf16>, vector<256x64xbf16>, vector<16x64xf32> -> vector<16x64xf32>
    %c0_40 = arith.constant 0 : index
    %c0_41 = arith.constant 0 : index
    %58 = vector.load %arg16[%c0_40, %c0_41] : memref<1x64xf32, #tpu.memory_space<vmem>>, vector<1x64xf32>
    %59 = vector.broadcast %58 : vector<1x64xf32> to vector<16x64xf32>
    %60 = arith.addf %57, %59 : vector<16x64xf32>
    %61 = arith.negf %60 : vector<16x64xf32>
    %62 = math.exp %61 : vector<16x64xf32>
    %cst_42 = arith.constant 1.000000e+00 : f32
    %63 = vector.broadcast %cst_42 : f32 to vector<16x64xf32>
    %64 = arith.addf %63, %62 : vector<16x64xf32>
    %65 = arith.divf %63, %64 : vector<16x64xf32>
    %cst_43 = arith.constant 0.000000e+00 : f32
    %66 = vector.broadcast %cst_43 : f32 to vector<16x32xf32>
    %67 = tpu.concatenate %65, %24, %30, %66 in 1 : vector<16x64xf32>, vector<16x16xf32>, vector<16x16xf32>, vector<16x32xf32> -> vector<16x128xf32>
    %c0_44 = arith.constant 0 : index
    %c0_45 = arith.constant 0 : index
    %68 = vector.load %arg17[%c0_44, %c0_45] : memref<16x128xf32, #tpu.memory_space<vmem>>, vector<16x128xf32>
    tpu.vector_store %arg17[%c0_44, %c0_45], %67 {strides = array<i32>} : memref<16x128xf32, #tpu.memory_space<vmem>>, vector<16x128xf32>,
    return
  }
  func.func @transform_0(%arg0: i32) -> (i32, i32) {
    %c0_i32 = arith.constant 0 : i32
    %c0_i32_0 = arith.constant 0 : i32
    return %arg0, %c0_i32 : i32, i32
  }
  func.func @transform_1(%arg0: i32) -> (i32, i32) {
    %c0_i32 = arith.constant 0 : i32
    %c0_i32_0 = arith.constant 0 : i32
    return %arg0, %c0_i32 : i32, i32
  }
  func.func @transform_2(%arg0: i32) -> (i32, i32) {
    %c0_i32 = arith.constant 0 : i32
    %c0_i32_0 = arith.constant 0 : i32
    %c0_i32_1 = arith.constant 0 : i32
    return %c0_i32, %c0_i32_0 : i32, i32
  }
  func.func @transform_3(%arg0: i32) -> (i32, i32) {
    %c0_i32 = arith.constant 0 : i32
    %c0_i32_0 = arith.constant 0 : i32
    %c0_i32_1 = arith.constant 0 : i32
    return %c0_i32, %c0_i32_0 : i32, i32
  }
  func.func @transform_4(%arg0: i32) -> (i32, i32) {
    %c0_i32 = arith.constant 0 : i32
    %c0_i32_0 = arith.constant 0 : i32
    %c0_i32_1 = arith.constant 0 : i32
    return %c0_i32, %c0_i32_0 : i32, i32
  }
  func.func @transform_5(%arg0: i32) -> (i32, i32) {
    %c0_i32 = arith.constant 0 : i32
    %c0_i32_0 = arith.constant 0 : i32
    %c0_i32_1 = arith.constant 0 : i32
    return %c0_i32, %c0_i32_0 : i32, i32
  }
  func.func @transform_6(%arg0: i32) -> (i32, i32) {
    %c0_i32 = arith.constant 0 : i32
    %c0_i32_0 = arith.constant 0 : i32
    %c0_i32_1 = arith.constant 0 : i32
    return %c0_i32, %c0_i32_0 : i32, i32
  }
  func.func @transform_7(%arg0: i32) -> (i32, i32) {
    %c0_i32 = arith.constant 0 : i32
    %c0_i32_0 = arith.constant 0 : i32
    %c0_i32_1 = arith.constant 0 : i32
    return %c0_i32, %c0_i32_0 : i32, i32
  }
  func.func @transform_8(%arg0: i32) -> (i32, i32) {
    %c0_i32 = arith.constant 0 : i32
    %c0_i32_0 = arith.constant 0 : i32
    %c0_i32_1 = arith.constant 0 : i32
    return %c0_i32, %c0_i32_0 : i32, i32
  }
  func.func @transform_9(%arg0: i32) -> (i32, i32) {
    %c0_i32 = arith.constant 0 : i32
    %c0_i32_0 = arith.constant 0 : i32
    %c0_i32_1 = arith.constant 0 : i32
    return %c0_i32, %c0_i32_0 : i32, i32
  }
  func.func @transform_10(%arg0: i32) -> (i32, i32) {
    %c0_i32 = arith.constant 0 : i32
    %c0_i32_0 = arith.constant 0 : i32
    %c0_i32_1 = arith.constant 0 : i32
    return %c0_i32, %c0_i32_0 : i32, i32
  }
  func.func @transform_11(%arg0: i32) -> (i32, i32) {
    %c0_i32 = arith.constant 0 : i32
    %c0_i32_0 = arith.constant 0 : i32
    %c0_i32_1 = arith.constant 0 : i32
    return %c0_i32, %c0_i32_0 : i32, i32
  }
  func.func @transform_12(%arg0: i32) -> (i32, i32) {
    %c0_i32 = arith.constant 0 : i32
    %c0_i32_0 = arith.constant 0 : i32
    %c0_i32_1 = arith.constant 0 : i32
    return %c0_i32, %c0_i32_0 : i32, i32
  }
  func.func @transform_13(%arg0: i32) -> (i32, i32) {
    %c0_i32 = arith.constant 0 : i32
    %c0_i32_0 = arith.constant 0 : i32
    %c0_i32_1 = arith.constant 0 : i32
    return %c0_i32, %c0_i32_0 : i32, i32
  }
  func.func @transform_14(%arg0: i32) -> (i32, i32) {
    %c0_i32 = arith.constant 0 : i32
    %c0_i32_0 = arith.constant 0 : i32
    %c0_i32_1 = arith.constant 0 : i32
    return %c0_i32, %c0_i32_0 : i32, i32
  }
  func.func @transform_15(%arg0: i32) -> (i32, i32) {
    %c0_i32 = arith.constant 0 : i32
    %c0_i32_0 = arith.constant 0 : i32
    %c0_i32_1 = arith.constant 0 : i32
    return %c0_i32, %c0_i32_0 : i32, i32
  }
  func.func @transform_16(%arg0: i32) -> (i32, i32) {
    %c0_i32 = arith.constant 0 : i32
    %c0_i32_0 = arith.constant 0 : i32
    return %arg0, %c0_i32 : i32, i32
  }
}

</mosaic_0001>

<bundles_post_ra>
// kernel: tpu_custom_call.1
= control target key start
LH: loop header
LB: loop body
LE: loop exit
PB: predicated region body
PF: predicated region fallthrough
CT: control target
= control target key end

     0   :  { %s1930_s0 = inlined_call_operand.hbm [shape: f32[16,64], index: 0, kind: input, shape index: {}]   ;;  %s1931_s1 = inlined_call_operand.hbm [shape: f32[16,16], index: 1, kind: input, shape index: {}]   ;;  %s1932_s2 = inlined_call_operand.hbm [shape: bf16[64,256], index: 2, kind: input, shape index: {}]   ;;  %s1933_s3 = inlined_call_operand.hbm [shape: f32[1,256], index: 3, kind: input, shape index: {}]   ;;  %s1934_s4 = inlined_call_operand.vmem [shape: bf16[256,128], index: 4, kind: input, shape index: {}]   ;;  %s1935_s5 = inlined_call_operand.vmem [shape: f32[1,128], index: 5, kind: input, shape index: {}]   ;;  %s1936_s6 = inlined_call_operand.vmem [shape: bf16[128,16], index: 6, kind: input, shape index: {}]   ;;  %s1937_s7 = inlined_call_operand.hbm [shape: f32[1,16], index: 7, kind: input, shape index: {}]   ;;  %s1938_s8 = inlined_call_operand.vmem [shape: bf16[128,16], index: 8, kind: input, shape index: {}]   ;;  %s1939_s9 = inlined_call_operand.vmem [shape: f32[1,16], index: 9, kind: input, shape index: {}]   ;;  %s1940_s10 = inlined_call_operand.vmem [shape: bf16[16,128], index: 10, kind: input, shape index: {}]   ;;  %s1941_s11 = inlined_call_operand.vmem [shape: f32[1,128], index: 11, kind: input, shape index: {}]   ;;  %s1942_s12 = inlined_call_operand.vmem [shape: bf16[128,256], index: 12, kind: input, shape index: {}]   ;;  %s1943_s13 = inlined_call_operand.vmem [shape: f32[1,256], index: 13, kind: input, shape index: {}]   ;;  %s1944_s14 = inlined_call_operand.vmem [shape: bf16[256,64], index: 14, kind: input, shape index: {}]   ;;  %s1945_s15 = inlined_call_operand.vmem [shape: f32[1,64], index: 15, kind: input, shape index: {}]   ;;  %s1946_s16 = inlined_call_operand.hbm [shape: f32[16,128], index: 16, kind: output, shape index: {}]  }
   0x1   :  { %1947 = sst [smem:[#allocation16_spill]] %s1930_s0 }
   0x2   :  { %21 = vsyncpa [#allocation3], 0 }
   0x3   :  { %22 = vsyncpa [#allocation6], 0 }
   0x4   :  { %23 = vsyncpa [#allocation9], 0 }
   0x5   :  { %24 = vsyncpa [#allocation4], 0  ;;  %s42_s23 = sshll.u32 %s1931_s1, 4  ;;  %s1539_s24 = smov [#allocation5]   ;;  %s43_s23 = int_to_ptr.hbm [resolvable:$true] %s42_s23 }
   0x6   :  { %s44_s25 = sshll.u32 %s1539_s24, 4  ;;  %s69_s28 = sshll.u32 %s1933_s3, 4  ;;  %s45_s25 = int_to_ptr.vmem [resolvable:$true] %s44_s25  ;;  %s70_s28 = int_to_ptr.hbm [resolvable:$true] %s69_s28 }
   0x7   :  { %s1540_s29 = smov 128   ;;  %s1541_s30 = smov 8  }
   0x8   :  { %50 = dma.hbm_to_vmem [thread:$0]  %s43_s23, 256, %s45_s25, [#allocation6], %s1540_s29, %s1540_s29, %s1541_s30  }
   0x9   :  { %s1542_s0 = smov [#allocation8]   ;;  %s1948_s1 = sld [smem:[#allocation16_spill]] }
   0xa   :  { %s71_s17 = sshll.u32 %s1542_s0, 4  ;;  %s55_s3 = sshll.u32 %s1932_s2, 4  ;;  %s72_s17 = int_to_ptr.vmem [resolvable:$true] %s71_s17  ;;  %s56_s3 = int_to_ptr.hbm [resolvable:$true] %s55_s3 }
   0xb   :  { %74 = dma.hbm_to_vmem [thread:$0]  %s70_s28, 32, %s72_s17, [#allocation9]  }
   0xc   :  { %s1543_s24 = smov [#allocation2]   ;;  %s1544_s23 = smov [#allocation7]  }
   0xd   :  { %s31_s26 = sshll.u32 %s1543_s24, 4  ;;  %s57_s25 = sshll.u32 %s1544_s23, 4  ;;  %s32_s26 = int_to_ptr.vmem [resolvable:$true] %s31_s26  ;;  %s58_s25 = int_to_ptr.vmem [resolvable:$true] %s57_s25 }
   0xe   :  { %s86_s18 = sshll.u32 %s1937_s7, 4  ;;  %s1545_s2 = smov [#allocation10]   ;;  %s87_s18 = int_to_ptr.hbm [resolvable:$true] %s86_s18 }
   0xf   :  { %s29_s20 = sshll.u32 %s1948_s1, 4  ;;  %s88_s28 = sshll.u32 %s1545_s2, 4  ;;  %s30_s20 = int_to_ptr.hbm [resolvable:$true] %s29_s20  ;;  %s89_s28 = int_to_ptr.vmem [resolvable:$true] %s88_s28 }
  0x10   :  { %37 = dma.hbm_to_vmem [thread:$0]  %s30_s20, 256, %s32_s26, [#allocation3], %s1540_s29, %s1540_s29, %s1541_s30  }
  0x11   :  { %63 = dma.hbm_to_vmem [thread:$0]  %s56_s3, 1024, %s58_s25, [#allocation6], %s1540_s29, %s1540_s29, %s1541_s30  }
  0x12   :  { %91 = dma.hbm_to_vmem [thread:$0]  %s87_s18, 16, %s89_s28, [#allocation9]  }
  0x13   :  { %1531 = dma.done.wait [#allocation3], 256  }
  0x14   :  { %1532 = vsyncadd [#allocation3], 4294967040 }
  0x15   :  { %1533 = dma.done.wait [#allocation6], 1280  }
  0x16   :  { %1534 = vsyncadd [#allocation6], 4294966016 }
  0x17   :  { %1535 = dma.done.wait [#allocation9], 48  }
  0x18   :  { %1536 = vsyncadd [#allocation9], 4294967248  ;;  %v1016_v0 = vld [vmem:[#allocation7 + $0x30] sm:$0xf]  ;;  %v1294_v1 = vld [vmem:[#allocation7 + $0x34] sm:$0xf0] }
  0x19   :  { %v1293_v2 = vld [vmem:[#allocation7 + $0x34] sm:$0xf]  ;;  %v1017_v3 = vor.u32 %v1294_v1, %v1016_v0  ;;  %v1018_v4 = vld [vmem:[#allocation7 + $0x38] sm:$0xf0]  ;;  %v1008_v5 = vld [vmem:[#allocation7 + $0x20] sm:$0xf] }
  0x1a   :  { %v1292_v6 = vld [vmem:[#allocation7 + $0x24] sm:$0xf0]  ;;  %v1021_v7 = vor.u32 %v1293_v2, %v1018_v4  ;;  %v1291_v8 = vld [vmem:[#allocation7 + $0x24] sm:$0xf]  ;;  %v1010_v9 = vld [vmem:[#allocation7 + $0x28] sm:$0xf0] }
  0x1b   :  { %194 = vmatpush.bf16.msra.mxu0 %v1017_v3  ;;  %v1009_v10 = vor.u32 %v1292_v6, %v1008_v5  ;;  %v1013_v11 = vor.u32 %v1291_v8, %v1010_v9  ;;  %v1000_v12 = vld [vmem:[#allocation7 + $0x10] sm:$0xf]  ;;  %v1290_v13 = vld [vmem:[#allocation7 + $0x14] sm:$0xf0]  ;;  %v1289_v14 = vld [vmem:[#allocation7 + $0x14] sm:$0xf] }
  0x1c   :  { %208 = vmatpush.bf16.msra.mxu1 %v1021_v7  ;;  %v1002_v15 = vld [vmem:[#allocation7 + $0x18] sm:$0xf0]  ;;  %v1001_v18 = vor.u32 %v1290_v13, %v1000_v12  ;;  %v992_v19 = vld [vmem:[#allocation7] sm:$0xf]  ;;  %v1288_v20 = vld [vmem:[#allocation7 + $0x4] sm:$0xf0] }
  0x1d   :  { %v1302_v16 = vld [vmem:[%s1934_s4 + $0x38] sm:$0xff]  ;;  %v1005_v21 = vor.u32 %v1289_v14, %v1002_v15  ;;  %v1287_v22 = vld [vmem:[#allocation7 + $0x4] sm:$0xf]  ;;  %v994_v23 = vld [vmem:[#allocation7 + $0x8] sm:$0xf0]  ;;  %v993_v26 = vor.u32 %v1288_v20, %v992_v19  ;;  %vm186_vm0 = vcmask 523264  }
  0x1e   :  { %v1310_v17 = vld [vmem:[%s1934_s4 + $0x78] sm:$0xff]  ;;  %360 = vmatpush.bf16.msra.mxu2 %v1302_v16  ;;  %v1301_v24 = vld [vmem:[%s1934_s4 + $0x30] sm:$0xff]  ;;  %v129_v27 = vld [vmem:[#allocation2] sm:$0xff]  ;;  %v997_v29 = vor.u32 %v1287_v22, %v994_v23  ;;  %s1546_s18 = smov 80   ;;  %s1547_s2 = smov 64   ;;  %vm582_vm1 = vcmask 130048  }
  0x1f   :  { %195 = vmatpush.bf16.msra.mxu0 %v1009_v10  ;;  %374 = vmatpush.bf16.msra.mxu3 %v1310_v17  ;;  %v1309_v25 = vld [vmem:[%s1934_s4 + $0x70] sm:$0xff]  ;;  %v130_v28 = vld [vmem:[#allocation2 + $0x8] sm:$0xff]  ;;  %v1299_v33 = vld [vmem:[%s1934_s4 + $0x20] sm:$0xff]  ;;  %vm961_vm6 = vcmask 654336   ;;  %vm964_vm7 = vcmask 785408   ;;  %s975_s21 = sshll.u32 %s1946_s16, 4  ;;  %s976_s21 = int_to_ptr.hbm [resolvable:$true] %s975_s21 }
  0x20   :  { %209 = vmatpush.bf16.msra.mxu1 %v1013_v11  ;;  %v1300_v30 = vld [vmem:[%s1934_s4 + $0x28] sm:$0xff]  ;;  %v139_v32 = vpack.c.bf16 %v130_v28, %v129_v27  ;;  %v1307_v34 = vld [vmem:[%s1934_s4 + $0x60] sm:$0xff]  ;;  %v1298_v35 = vld [vmem:[%s1934_s4 + $0x18] sm:$0xff] }
  0x21   :  { %v1308_v31 = vld [vmem:[%s1934_s4 + $0x68] sm:$0xff]  ;;  %v1306_v36 = vld [vmem:[%s1934_s4 + $0x58] sm:$0xff]  ;;  %v1297_v37 = vld [vmem:[%s1934_s4 + $0x10] sm:$0xff] }
  0x22   :  { %361 = vmatpush.bf16.msra.mxu2 %v1301_v24  ;;  %v1305_v38 = vld [vmem:[%s1934_s4 + $0x50] sm:$0xff]  ;;  %v1296_v39 = vld [vmem:[%s1934_s4 + $0x8] sm:$0xff]  ;;  %v1295_v41 = vld [vmem:[%s1934_s4] sm:$0xff] }
  0x23   :  { %196 = vmatpush.bf16.msra.mxu0 %v1001_v18  ;;  %375 = vmatpush.bf16.msra.mxu3 %v1309_v25  ;;  %v1304_v40 = vld [vmem:[%s1934_s4 + $0x48] sm:$0xff]  ;;  %v1303_v42 = vld [vmem:[%s1934_s4 + $0x40] sm:$0xff]  ;;  %v1318_v43 = vld [vmem:[%s1936_s6 + $0x38] sm:$0xff] }
  0x24   :  { %210 = vmatpush.bf16.msra.mxu1 %v1005_v21  ;;  %v1326_v44 = vld [vmem:[%s1938_s8 + $0x38] sm:$0xff]  ;;  %v1317_v45 = vld [vmem:[%s1936_s6 + $0x30] sm:$0xff]  ;;  %v1316_v47 = vld [vmem:[%s1936_s6 + $0x28] sm:$0xff] }
  0x25   :  { %v1325_v46 = vld [vmem:[%s1938_s8 + $0x30] sm:$0xff]  ;;  %v1324_v48 = vld [vmem:[%s1938_s8 + $0x28] sm:$0xff]  ;;  %v140_v49 = vld [vmem:[#allocation8] sm:$0x3] }
  0x26   :  { %362 = vmatpush.bf16.msra.mxu2 %v1300_v30  ;;  %v142_v51 = vperm.slane %v140_v49, 0  ;;  %v143_v53 = vperm.slane %v140_v49, 1  ;;  %v1315_v6 = vld [vmem:[%s1936_s6 + $0x20] sm:$0xff]  ;;  %v1314_v8 = vld [vmem:[%s1936_s6 + $0x18] sm:$0xff]  ;;  %v1313_v10 = vld [vmem:[%s1936_s6 + $0x10] sm:$0xff] }
  0x27   :  { %197 = vmatpush.bf16.msra.mxu0 %v993_v26  ;;  %376 = vmatpush.bf16.msra.mxu3 %v1308_v31  ;;  %v1323_v7 = vld [vmem:[%s1938_s8 + $0x20] sm:$0xff]  ;;  %v1322_v9 = vld [vmem:[%s1938_s8 + $0x18] sm:$0xff]  ;;  %v1321_v11 = vld [vmem:[%s1938_s8 + $0x10] sm:$0xff] }
  0x28   :  { %211 = vmatpush.bf16.msra.mxu1 %v997_v29  ;;  %v1312_v12 = vld [vmem:[%s1936_s6 + $0x8] sm:$0xff]  ;;  %v1311_v14 = vld [vmem:[%s1936_s6] sm:$0xff] }
  0x29   :  { %v1320_v13 = vld [vmem:[%s1938_s8 + $0x8] sm:$0xff]  ;;  %v1319_v15 = vld [vmem:[%s1938_s8] sm:$0xff] }
  0x2a   :  { %1022 = vmatmul.msk.bf16.vlgmr.msra.gmra.mxu0 %vm186_vm0, %v139_v32  ;;  %363 = vmatpush.bf16.msra.mxu2 %v1299_v33  ;;  %v1370_v16 = vld [vmem:[%s1935_s5] ss:$0 sm:$0xff]  ;;  %v1371_v31 = vld [vmem:[#allocation10] ss:$0 sm:$0xff] }
  0x2b   :  { %1023 = vmatmul.msk.bf16.vlgmr.msra.gmra.mxu1 %vm186_vm0, %v139_v32  ;;  %377 = vmatpush.bf16.msra.mxu3 %v1307_v34  ;;  %v1327_v30 = vld [vmem:[%s1940_s10] sm:$0xff] }
  0x2c   :  { %461 = vmatpush.bf16.msrb.mxu0 %v1318_v43  ;;  %543 = vmatpush.bf16.msrb.mxu1 %v1326_v44  ;;  %v1372_v32 = vld [vmem:[%s1939_s9] ss:$0 sm:$0xff] }
  0x2e   :  { %364 = vmatpush.bf16.msra.mxu2 %v1298_v35 }
  0x2f   :  { %378 = vmatpush.bf16.msra.mxu3 %v1306_v36 }
  0x30   :  { %462 = vmatpush.bf16.msrb.mxu0 %v1317_v45  ;;  %544 = vmatpush.bf16.msrb.mxu1 %v1325_v46  ;;  %v563_v46 = vld [vmem:[#allocation5] sm:$0xff] }
  0x32   :  { %365 = vmatpush.bf16.msra.mxu2 %v1297_v37 }
  0x33   :  { %379 = vmatpush.bf16.msra.mxu3 %v1305_v38 }
  0x34   :  { %463 = vmatpush.bf16.msrb.mxu0 %v1316_v47  ;;  %545 = vmatpush.bf16.msrb.mxu1 %v1324_v48  ;;  %v564_v47 = vld [vmem:[#allocation5 + $0x8] sm:$0xff] }
  0x36   :  { %366 = vmatpush.bf16.msra.mxu2 %v1296_v39 }
  0x37   :  { %380 = vmatpush.bf16.msra.mxu3 %v1304_v40 }
  0x38   :  { %464 = vmatpush.bf16.msrb.mxu0 %v1315_v6  ;;  %546 = vmatpush.bf16.msrb.mxu1 %v1323_v7 }
  0x3a   :  { %367 = vmatpush.bf16.msra.mxu2 %v1295_v41 }
  0x3b   :  { %381 = vmatpush.bf16.msra.mxu3 %v1303_v42 }
  0x3c   :  { %465 = vmatpush.bf16.msrb.mxu0 %v1314_v8  ;;  %547 = vmatpush.bf16.msrb.mxu1 %v1322_v9  ;;  %v1191_v8 = vld [vmem:[%s1942_s12 + $0x40] sm:$0xf]  ;;  %v1337_v9 = vld [vmem:[%s1942_s12 + $0x44] sm:$0xf0] }
  0x3e   :  { %593 = vmatpush.bf16.msrb.mxu2 %v1327_v30  ;;  %v1169_v30 = vld [vmem:[%s1942_s12 + $0x18] sm:$0xf0] }
  0x40   :  { %466 = vmatpush.bf16.msrb.mxu0 %v1313_v10  ;;  %548 = vmatpush.bf16.msrb.mxu1 %v1321_v11  ;;  %v1336_v10 = vld [vmem:[%s1942_s12 + $0x44] sm:$0xf]  ;;  %v1193_v11 = vld [vmem:[%s1942_s12 + $0x48] sm:$0xf0] }
  0x44   :  { %467 = vmatpush.bf16.msrb.mxu0 %v1312_v12  ;;  %549 = vmatpush.bf16.msrb.mxu1 %v1320_v13  ;;  %v1192_v12 = vor.u32 %v1337_v9, %v1191_v8  ;;  %v1196_v13 = vor.u32 %v1336_v10, %v1193_v11 }
  0x48   :  { %468 = vmatpush.bf16.msrb.mxu0 %v1311_v14  ;;  %550 = vmatpush.bf16.msrb.mxu1 %v1319_v15  ;;  %v1183_v14 = vld [vmem:[%s1942_s12 + $0x30] sm:$0xf]  ;;  %v1335_v15 = vld [vmem:[%s1942_s12 + $0x34] sm:$0xf0] }
  0xa7   :  { %v199_v50 = vpop.f32.mrf.mxu0 }
  0xa8   :  { %v213_v52 = vpop.f32.mrf.mxu1  ;;  %v200_v54 = vadd.f32 %v199_v50, %v142_v51 }
  0xa9   :  { %v214_v55 = vadd.f32 %v213_v52, %v143_v53 }
  0xaa   :  { %v218_v57 = vmul.f32 0.1, %v200_v54 }
  0xab   :  { %v219_v60 = vmul.f32 0.1, %v214_v55 }
  0xac   :  { %v222_v0 = vmax.f32 %v200_v54, %v218_v57  ;;  %v1215_v54 = vld [vmem:[%s1942_s12 + $0x70] sm:$0xf] }
  0xad   :  { %v223_v2 = vmax.f32 %v214_v55, %v219_v60  ;;  %v1343_v55 = vld [vmem:[%s1942_s12 + $0x74] sm:$0xf0]  ;;  %v1341_v60 = vld [vmem:[%s1942_s12 + $0x64] sm:$0xf0] }
  0xae   :  { %v1216_v57 = vor.u32 %v1343_v55, %v1215_v54  ;;  %v1349_v54 = vld [vmem:[%s1944_s14 + $0x28] sm:$0xff]  ;;  %v1355_v55 = vld [vmem:[%s1944_s14 + $0x58] sm:$0xff] }
  0xaf   :  { %v201_v56 = vpop.f32.mrf.mxu0 }
  0xb0   :  { %v202_v58 = vadd.f32 %v201_v56, %v142_v51  ;;  %v215_v59 = vpop.f32.mrf.mxu1  ;;  %v1342_v56 = vld [vmem:[%s1942_s12 + $0x74] sm:$0xf]  ;;  %707 = vmatpush.bf16.msrb.mxu3 %v1216_v57 }
  0xb1   :  { %v216_v61 = vadd.f32 %v215_v59, %v143_v53  ;;  %v1207_v59 = vld [vmem:[%s1942_s12 + $0x60] sm:$0xf]  ;;  %v1354_v57 = vld [vmem:[%s1944_s14 + $0x50] sm:$0xff] }
  0xb2   :  { %v220_v62 = vmul.f32 0.1, %v202_v58 }
  0xb3   :  { %v221_v63 = vmul.f32 0.1, %v216_v61 }
  0xb4   :  { %v224_v1 = vmax.f32 %v202_v58, %v220_v62  ;;  %v1217_v58 = vld [vmem:[%s1942_s12 + $0x78] sm:$0xf0]  ;;  %v1340_v62 = vld [vmem:[%s1942_s12 + $0x64] sm:$0xf] }
  0xb5   :  { %v225_v3 = vmax.f32 %v216_v61, %v221_v63  ;;  %v1220_v61 = vor.u32 %v1342_v56, %v1217_v58  ;;  %v1209_v63 = vld [vmem:[%s1942_s12 + $0x68] sm:$0xf0]  ;;  %v1348_v56 = vld [vmem:[%s1944_s14 + $0x20] sm:$0xff]  ;;  %v1347_v58 = vld [vmem:[%s1944_s14 + $0x18] sm:$0xff] }
  0xb6   :  { %v258_v4 = vpack.c.bf16 %v224_v1, %v222_v0  ;;  %v1208_v0 = vor.u32 %v1341_v60, %v1207_v59  ;;  %v1212_v1 = vor.u32 %v1340_v62, %v1209_v63  ;;  %v1353_v59 = vld [vmem:[%s1944_s14 + $0x48] sm:$0xff]  ;;  %v1346_v60 = vld [vmem:[%s1944_s14 + $0x10] sm:$0xff]  ;;  %v1344_v63 = vld [vmem:[%s1944_s14] sm:$0xff] }
  0xb7   :  { %v259_v5 = vpack.c.bf16 %v225_v3, %v223_v2  ;;  %721 = vmatpush.bf16.msra.mxu0 %v1220_v61  ;;  %v1199_v2 = vld [vmem:[%s1942_s12 + $0x50] sm:$0xf]  ;;  %v1339_v3 = vld [vmem:[%s1942_s12 + $0x54] sm:$0xf0]  ;;  %v1352_v61 = vld [vmem:[%s1944_s14 + $0x40] sm:$0xff] }
  0xb8   :  { %368 = vmatmul.bf16.vlgmr.msra.gmra.mxu2 %v258_v4  ;;  %v1338_v4 = vld [vmem:[%s1942_s12 + $0x54] sm:$0xf]  ;;  %708 = vmatpush.bf16.msrb.mxu3 %v1208_v0  ;;  %v1200_v6 = vor.u32 %v1339_v3, %v1199_v2  ;;  %v1345_v62 = vld [vmem:[%s1944_s14 + $0x8] sm:$0xff]  ;;  %v621_v0 = vld [vmem:[%s1943_s13] sm:$0x3] }
  0xb9   :  { %382 = vmatmul.bf16.vlgmr.msra.gmra.mxu3 %v259_v5  ;;  %v1201_v5 = vld [vmem:[%s1942_s12 + $0x58] sm:$0xf0]  ;;  %v624_v2 = vperm.slane %v621_v0, 1 }
  0xba   :  { %v1204_v7 = vor.u32 %v1338_v4, %v1201_v5  ;;  %v623_v5 = vperm.slane %v621_v0, 0 }
  0xbb   :  { %722 = vmatpush.bf16.msra.mxu0 %v1212_v1 }
  0xbc   :  { %709 = vmatpush.bf16.msrb.mxu3 %v1200_v6 }
  0xbf   :  { %723 = vmatpush.bf16.msra.mxu0 %v1204_v7 }
  0xc0   :  { %710 = vmatpush.bf16.msrb.mxu3 %v1192_v12 }
  0xc3   :  { %724 = vmatpush.bf16.msra.mxu0 %v1196_v13 }
 0x13b   :  { %v369_v17 = vpop.f32.mrf.mxu2 }
 0x13c   :  { %v383_v18 = vpop.f32.mrf.mxu3  ;;  %v370_v19 = vadd.f32 %v1370_v16, %v369_v17  ;;  %v1184_v17 = vor.u32 %v1335_v15, %v1183_v14 }
 0x13e   :  { %v384_v20 = vadd.f32 %v383_v18, %v370_v19  ;;  %v1185_v18 = vld [vmem:[%s1942_s12 + $0x38] sm:$0xf0]  ;;  %711 = vmatpush.bf16.msrb.mxu3 %v1184_v17 }
 0x140   :  { %v388_v24 = vmul.f32 0.1, %v384_v20 }
 0x142   :  { %v390_v27 = vmax.f32 %v384_v20, %v388_v24  ;;  %v1175_v20 = vld [vmem:[%s1942_s12 + $0x20] sm:$0xf]  ;;  %v1177_v24 = vld [vmem:[%s1942_s12 + $0x28] sm:$0xf0] }
 0x143   :  { %v371_v21 = vpop.f32.mrf.mxu2 }
 0x144   :  { %v372_v22 = vadd.f32 %v1370_v16, %v371_v21  ;;  %v385_v23 = vpop.f32.mrf.mxu3  ;;  %v1334_v16 = vld [vmem:[%s1942_s12 + $0x34] sm:$0xf]  ;;  %v1333_v21 = vld [vmem:[%s1942_s12 + $0x24] sm:$0xf0] }
 0x145   :  { %v1188_v19 = vor.u32 %v1334_v16, %v1185_v18 }
 0x146   :  { %v386_v25 = vadd.f32 %v385_v23, %v372_v22  ;;  %v1332_v22 = vld [vmem:[%s1942_s12 + $0x24] sm:$0xf]  ;;  %v1176_v23 = vor.u32 %v1333_v21, %v1175_v20  ;;  %v1374_v21 = vld [vmem:[%s1945_s15] ss:$0 sm:$0xff]  ;;  %s1548_s15 = smov [#allocation11]  }
 0x147   :  { %725 = vmatpush.bf16.msra.mxu0 %v1188_v19  ;;  %s973_s19 = sshll.u32 %s1548_s15, 4  ;;  %s974_s19 = int_to_ptr.vmem [resolvable:$true] %s973_s19 }
 0x148   :  { %v389_v26 = vmul.f32 0.1, %v386_v25  ;;  %712 = vmatpush.bf16.msrb.mxu3 %v1176_v23 }
 0x14a   :  { %v391_v28 = vmax.f32 %v386_v25, %v389_v26  ;;  %v1180_v25 = vor.u32 %v1332_v22, %v1177_v24  ;;  %v1167_v26 = vld [vmem:[%s1942_s12 + $0x10] sm:$0xf] }
 0x14c   :  { %v408_v29 = vpack.c.bf16 %v391_v28, %v390_v27  ;;  %726 = vmatpush.bf16.msra.mxu0 %v1180_v25  ;;  %v1331_v27 = vld [vmem:[%s1942_s12 + $0x14] sm:$0xf0]  ;;  %v1330_v28 = vld [vmem:[%s1942_s12 + $0x14] sm:$0xf] }
 0x14e   :  { %469 = vmatmul.bf16.vlgmr.msrb.gmra.mxu0 %v408_v29  ;;  %551 = vmatmul.bf16.vlgmr.msrb.gmra.mxu1 %v408_v29  ;;  %v1168_v29 = vor.u32 %v1331_v27, %v1167_v26 }
 0x150   :  { %713 = vmatpush.bf16.msrb.mxu3 %v1168_v29 }
 0x1cb   :  { %v470_v33 = vpop.f32.mrf.mxu0  ;;  %v552_v34 = vpop.f32.mrf.mxu1 }
 0x1cc   :  { %v471_v35 = vadd.f32 %v1371_v31, %v470_v33  ;;  %v553_v36 = vadd.f32 %v1372_v32, %v552_v34  ;;  %v1329_v33 = vld [vmem:[%s1942_s12 + $0x4] sm:$0xf0]  ;;  %v1328_v34 = vld [vmem:[%s1942_s12 + $0x4] sm:$0xf] }
 0x1ce   :  { %v557_v37 = vmul.f32 0.5, %v553_v36  ;;  %953 = vrot.lane.b32.xlu1 %v553_v36, %s1546_s18  ;;  %945 = vrot.lane.b32.xlu0 %v471_v35, %s1547_s2  ;;  %v1161_v36 = vld [vmem:[%s1942_s12 + $0x8] sm:$0xf0] }
 0x1d0   :  { %v559_v38 = vmul.f32 1.442695, %v557_v37  ;;  %v1164_v37 = vor.u32 %v1328_v34, %v1161_v36 }
 0x1d2   :  { %1375 = vpow2.f32 %v559_v38  ;;  %v1359_v38 = vld [vmem:[%s1944_s14 + $0x78] sm:$0xff] }
 0x1d3   :  { %v472_v39 = vpop.f32.mrf.mxu0  ;;  %v554_v40 = vpop.f32.mrf.mxu1  ;;  %891 = vmatpush.bf16.msra.mxu2 %v1359_v38 }
 0x1d4   :  { %v473_v41 = vadd.f32 %v1371_v31, %v472_v39  ;;  %v555_v42 = vadd.f32 %v1372_v32, %v554_v40  ;;  %v1172_v31 = vor.u32 %v1330_v28, %v1169_v30  ;;  %v1159_v32 = vld [vmem:[%s1942_s12] sm:$0xf]  ;;  %v1351_v39 = vld [vmem:[%s1944_s14 + $0x38] sm:$0xff]  ;;  %v1358_v40 = vld [vmem:[%s1944_s14 + $0x70] sm:$0xff] }
 0x1d5   :  { %877 = vmatpush.bf16.msra.mxu1 %v1351_v39 }
 0x1d6   :  { %v558_v43 = vmul.f32 0.5, %v555_v42  ;;  %955 = vrot.lane.b32.xlu1 %v555_v42, %s1546_s18  ;;  %947 = vrot.lane.b32.xlu0 %v473_v41, %s1547_s2  ;;  %v1357_v42 = vld [vmem:[%s1944_s14 + $0x68] sm:$0xff] }
 0x1d7   :  { %727 = vmatpush.bf16.msra.mxu0 %v1172_v31  ;;  %892 = vmatpush.bf16.msra.mxu2 %v1358_v40 }
 0x1d8   :  { %v561_v44 = vmul.f32 1.442695, %v558_v43  ;;  %v1376_v45 = vpop.eup %1375  ;;  %v1356_v43 = vld [vmem:[%s1944_s14 + $0x60] sm:$0xff] }
 0x1d9   :  { %v565_v48 = vmul.f32 %v1376_v45, %v563_v46  ;;  %v1373_v45 = vld [vmem:[%s1941_s11] ss:$0 sm:$0xff] }
 0x1da   :  { %1377 = vpow2.f32 %v561_v44 }
 0x1db   :  { %v567_v51 = vadd.f32 %v565_v48, %v471_v35  ;;  %v1160_v35 = vor.u32 %v1329_v33, %v1159_v32  ;;  %728 = vmatpush.bf16.msra.mxu0 %v1164_v37  ;;  %893 = vmatpush.bf16.msra.mxu2 %v1357_v42 }
 0x1dd   :  { %714 = vmatpush.bf16.msrb.mxu3 %v1160_v35 }
 0x1df   :  { %894 = vmatpush.bf16.msra.mxu2 %v1356_v43 }
 0x1e0   :  { %v1378_v49 = vpop.eup %1377 }
 0x1e1   :  { %v566_v50 = vmul.f32 %v1378_v49, %v564_v47 }
 0x1e3   :  { %v568_v52 = vadd.f32 %v566_v50, %v473_v41  ;;  %v1350_v41 = vld [vmem:[%s1944_s14 + $0x30] sm:$0xff]  ;;  %895 = vmatpush.bf16.msra.mxu2 %v1355_v55 }
 0x1e4   :  { %878 = vmatpush.bf16.msra.mxu1 %v1350_v41 }
 0x1e5   :  { %v571_v53 = vpack.c.bf16 %v568_v52, %v567_v51 }
 0x1e7   :  { %1156 = vmatmul.msk.bf16.vlgmr.msrb.gmra.mxu2 %vm582_vm1, %v571_v53 }
 0x1e8   :  { %879 = vmatpush.bf16.msra.mxu1 %v1349_v54  ;;  %896 = vmatpush.bf16.msra.mxu2 %v1354_v57 }
 0x1ec   :  { %880 = vmatpush.bf16.msra.mxu1 %v1348_v56  ;;  %897 = vmatpush.bf16.msra.mxu2 %v1353_v59 }
 0x1f0   :  { %881 = vmatpush.bf16.msra.mxu1 %v1347_v58  ;;  %898 = vmatpush.bf16.msra.mxu2 %v1352_v61 }
 0x1f4   :  { %882 = vmatpush.bf16.msra.mxu1 %v1346_v60 }
 0x1f8   :  { %883 = vmatpush.bf16.msra.mxu1 %v1345_v62 }
 0x1fc   :  { %884 = vmatpush.bf16.msra.mxu1 %v1344_v63 }
 0x26a   :  { %v595_v44 = vpop.f32.mrf.mxu2 }
 0x26b   :  { %v596_v46 = vadd.f32 %v1373_v45, %v595_v44  ;;  %v946_v44 = vpop.permute.xlu0 %945 }
 0x26d   :  { %v600_v48 = vmul.f32 0.1, %v596_v46 }
 0x26f   :  { %v602_v51 = vmax.f32 %v596_v46, %v600_v48  ;;  %v954_v46 = vpop.permute.xlu1 %953 }
 0x272   :  { %v597_v47 = vpop.f32.mrf.mxu2 }
 0x273   :  { %v598_v49 = vadd.f32 %v1373_v45, %v597_v47  ;;  %v948_v60 = vpop.permute.xlu0 %947 }
 0x275   :  { %v601_v50 = vmul.f32 0.1, %v598_v49 }
 0x277   :  { %v603_v52 = vmax.f32 %v598_v49, %v601_v50  ;;  %v956_v62 = vpop.permute.xlu1 %955 }
 0x279   :  { %v620_v53 = vpack.c.bf16 %v603_v52, %v602_v51 }
 0x27b   :  { %715 = vmatmul.bf16.vlgmr.msrb.gmra.mxu3 %v620_v53  ;;  %729 = vmatmul.bf16.vlgmr.msra.gmra.mxu0 %v620_v53 }
 0x2f8   :  { %v730_v1 = vpop.f32.mrf.mxu0 }
 0x2f9   :  { %v731_v3 = vadd.f32 %v730_v1, %v624_v2 }
 0x2fb   :  { %v736_v7 = vmul.f32 0.1, %v731_v3 }
 0x2fd   :  { %v740_v11 = vmax.f32 %v731_v3, %v736_v7 }
 0x2fe   :  { %v716_v4 = vpop.f32.mrf.mxu3 }
 0x2ff   :  { %v717_v9 = vadd.f32 %v716_v4, %v623_v5 }
 0x300   :  { %v732_v6 = vpop.f32.mrf.mxu0 }
 0x301   :  { %v733_v8 = vadd.f32 %v732_v6, %v624_v2  ;;  %v735_v14 = vmul.f32 0.1, %v717_v9 }
 0x303   :  { %v738_v10 = vmul.f32 0.1, %v733_v8  ;;  %v739_v18 = vmax.f32 %v717_v9, %v735_v14 }
 0x305   :  { %v742_v12 = vmax.f32 %v733_v8, %v738_v10 }
 0x306   :  { %v718_v13 = vpop.f32.mrf.mxu3 }
 0x307   :  { %v776_v15 = vpack.c.bf16 %v742_v12, %v740_v11  ;;  %v719_v16 = vadd.f32 %v718_v13, %v623_v5 }
 0x309   :  { %v737_v17 = vmul.f32 0.1, %v719_v16  ;;  %899 = vmatmul.bf16.vlgmr.msra.gmra.mxu2 %v776_v15 }
 0x30b   :  { %v741_v19 = vmax.f32 %v719_v16, %v737_v17 }
 0x30d   :  { %v775_v20 = vpack.c.bf16 %v741_v19, %v739_v18 }
 0x30f   :  { %885 = vmatmul.bf16.vlgmr.msra.gmra.mxu1 %v775_v20 }
 0x38c   :  { %v886_v22 = vpop.f32.mrf.mxu1  ;;  %v900_v23 = vpop.f32.mrf.mxu2 }
 0x38d   :  { %v887_v24 = vadd.f32 %v1374_v21, %v886_v22 }
 0x38f   :  { %v901_v25 = vadd.f32 %v900_v23, %v887_v24 }
 0x391   :  { %v1285_v26 = vmul.f32 -1.442695, %v901_v25 }
 0x393   :  { %1379 = vpow2.f32 %v1285_v26 }
 0x394   :  { %v888_v27 = vpop.f32.mrf.mxu1  ;;  %v902_v29 = vpop.f32.mrf.mxu2 }
 0x395   :  { %v889_v28 = vadd.f32 %v1374_v21, %v888_v27 }
 0x397   :  { %v903_v30 = vadd.f32 %v902_v29, %v889_v28 }
 0x399   :  { %v1380_v31 = vpop.eup %1379  ;;  %v1286_v32 = vmul.f32 -1.442695, %v903_v30 }
 0x39a   :  { %v911_v33 = vadd.f32 1.0, %v1380_v31 }
 0x39b   :  { %1381 = vpow2.f32 %v1286_v32 }
 0x39c   :  { %1383 = vrcp.f32 %v911_v33  ;;  %v924_v39 = vand.u32 2147483648, %v911_v33  ;;  %v922_v41 = vand.u32 2147483647, %v911_v33  ;;  %vm918_vm3 = vweird.f32 %v911_v33 }
 0x39e   :  { %v925_v45 = vor.u32 1.1754944e-38, %v924_v39  ;;  %vm923_vm5 = vcmp.eq.f32.partialorder %v922_v41, 8.507059e+37 }
 0x3a1   :  { %v1382_v34 = vpop.eup %1381 }
 0x3a2   :  { %v1384_v35 = vpop.eup %1383  ;;  %v912_v36 = vadd.f32 1.0, %v1382_v34 }
 0x3a3   :  { %v914_v37 = vmul.f32 %v1384_v35, %v911_v33  ;;  %vm919_vm2 = vweird.f32 %v1384_v35 }
 0x3a4   :  { %1385 = vrcp.f32 %v912_v36  ;;  %vm920_vm4 = vmor %vm918_vm3, %vm919_vm2  ;;  %v939_v52 = vand.u32 2147483648, %v912_v36  ;;  %v937_v55 = vand.u32 2147483647, %v912_v36  ;;  %vm933_vm9 = vweird.f32 %v912_v36 }
 0x3a5   :  { %v915_v38 = vsub.f32 1.0, %v914_v37 }
 0x3a6   :  { %v940_v58 = vor.u32 1.1754944e-38, %v939_v52  ;;  %vm938_vm11 = vcmp.eq.f32.partialorder %v937_v55, 8.507059e+37 }
 0x3a7   :  { %v916_v40 = vmul.f32 %v1384_v35, %v915_v38 }
 0x3a9   :  { %v917_v42 = vadd.f32 %v1384_v35, %v916_v40 }
 0x3aa   :  { %v1386_v43 = vpop.eup %1385 }
 0x3ab   :  { %v929_v47 = vmul.f32 %v1386_v43, %v912_v36  ;;  %v921_v48 = vsel %vm920_vm4, %v1384_v35, %v917_v42  ;;  %vm934_vm8 = vweird.f32 %v1386_v43 }
 0x3ac   :  { %v926_v49 = vsel %vm923_vm5, %v925_v45, %v921_v48  ;;  %vm935_vm10 = vmor %vm933_vm9, %vm934_vm8 }
 0x3ad   :  { %v930_v50 = vsub.f32 1.0, %v929_v47  ;;  %v959_v51 = vsel %vm186_vm0, %v926_v49, %v946_v44 }
 0x3ae   :  { %v962_v53 = vsel %vm961_vm6, %v959_v51, %v954_v46 }
 0x3af   :  { %v931_v54 = vmul.f32 %v1386_v43, %v930_v50  ;;  %v965_v56 = vsel %vm964_vm7, %v962_v53, 0.0 }
 0x3b0   :  { %967 = vst [vmem:[#allocation11] sm:$0xff] %v965_v56 }
 0x3b1   :  { %v932_v57 = vadd.f32 %v1386_v43, %v931_v54 }
 0x3b3   :  { %v936_v59 = vsel %vm935_vm10, %v1386_v43, %v932_v57 }
 0x3b4   :  { %v941_v61 = vsel %vm938_vm11, %v940_v58, %v936_v59 }
 0x3b5   :  { %v960_v63 = vsel %vm186_vm0, %v941_v61, %v948_v60 }
 0x3b6   :  { %v963_v0 = vsel %vm961_vm6, %v960_v63, %v956_v62 }
 0x3b7   :  { %v966_v1 = vsel %vm964_vm7, %v963_v0, 0.0 }
 0x3b8   :  { %968 = vst [vmem:[#allocation11 + $0x8] sm:$0xff] %v966_v1 }
 0x3b9   :  { %981 = dma.vmem_to_hbm [thread:$0]  %s974_s19, 256, %s976_s21, [#allocation4], %s1540_s29, %s1540_s29, %s1541_s30  }
 0x3ba   :  { %1537 = dma.done.wait [#allocation4], 256  }
 0x3bb   :  { %1538 = vsyncadd [#allocation4], 4294967040 }
 0x3bc   :  { %986 = vsyncpa [#allocation3], 1 }
 0x3bd   :  { %987 = vsyncpa [#allocation6], 1 }
 0x3be   :  { %988 = vsyncpa [#allocation9], 1 }
 0x3bf   :  { %989 = vsyncpa [#allocation4], 1 }

</bundles_post_ra>
